<compile_context>
chip_gen: v7x
topology: tpu7x:2x2x1
jax: 0.10.0
libtpu: 0.0.40
codegen_flags: <defaults>
</compile_context>

<pallas_src>
import functools

import jax
import jax.numpy as jnp
from jax.experimental import pallas as pl
from jax.experimental.pallas import tpu as pltpu


# ------------------------------ fused network kernel ------------------------------

def fused_net_kernel(*refs, n_fc):
    # refs = (patches, wc9, cb, w1, b1, w2, b2, ..., wL, bL, out)
    patches_ref, wc_ref, cb_ref = refs[0], refs[1], refs[2]
    fc_refs = refs[3:3 + 2 * n_fc]
    o_ref = refs[3 + 2 * n_fc]

    NT = patches_ref.shape[0]          # images per grid step (static)
    OC = wc_ref.shape[0]               # conv output channels (8)
    w1_ref, b1_ref = fc_refs[0], fc_refs[1]
    O1 = b1_ref.shape[1]

    # ---- Conv2d(1->OC, k=3) as im2col matmul + bias + ReLU, then the first Linear
    #      with the NCHW flatten folded into the weight layout (w1_ref[oc]: (P, O1)). ----
    rows = []
    for n in range(NT):                                      # NT small & static -> unrolled
        a = jnp.dot(wc_ref[...], patches_ref[n],
                    preferred_element_type=jnp.float32)      # (OC, P) on the MXU
        a = jnp.maximum(a + cb_ref[...], 0.0)                # bias + ReLU, f32
        a_lo = a.astype(w1_ref.dtype)
        acc = jnp.zeros((1, O1), jnp.float32)
        for oc in range(OC):                                 # channel-major flatten fold
            acc = acc + jnp.dot(a_lo[oc:oc + 1, :], w1_ref[oc],
                                preferred_element_type=jnp.float32)
        rows.append(acc)
    h = jnp.concatenate(rows, axis=0) if NT > 1 else rows[0]  # (NT, O1)
    h = jax.nn.sigmoid(h + b1_ref[...])                       # f32 epilogue
    # Dropout(p=0.2): identity in eval/inference mode.

    # ---- remaining Linear (+Sigmoid) layers: bf16 weights, f32 accumulation ----
    for li in range(1, n_fc):
        w_ref = fc_refs[2 * li]
        b_ref = fc_refs[2 * li + 1]
        h = jnp.dot(h.astype(w_ref.dtype), w_ref[...],
                    preferred_element_type=jnp.float32) + b_ref[...]
        if li < n_fc - 1:
            h = jax.nn.sigmoid(h)
        # Dropout after each hidden Sigmoid: identity in eval mode.

    o_ref[...] = jnp.expand_dims(h, 1).astype(o_ref.dtype)    # (NT, 1, OUT)


# ------------------------------------ wrappers ------------------------------------

def _full_spec(arr):
    nd = arr.ndim
    return pl.BlockSpec(arr.shape, lambda i, _nd=nd: (0,) * _nd)


def _pick_block_n(N):
    # Batch several images per grid step, but keep >=2 grid steps when possible so
    # dimension_semantics=("parallel",) can shard the batch across 2 TCs (v7x).
    for d in (8, 4, 2, 1):
        if N % d == 0 and N // d >= 2:
            return d
    return N


def fused_forward(patches, prep):
    """patches: (N, 9, Ho*Wo) f32 im2col input; prep: kernel-layout params."""
    N, nine, P = patches.shape
    assert nine == 9
    wc9, cb = prep["wc9"], prep["cb"]
    fc_ws, fc_bs = prep["fc_w"], prep["fc_b"]
    n_fc = len(fc_ws)
    assert n_fc >= 2
    OC = wc9.shape[0]
    OUT = fc_bs[-1].shape[1]

    block_n = _pick_block_n(N)
    grid = (N // block_n,)

    inputs = [patches, wc9, cb]
    in_specs = [pl.BlockSpec((block_n, 9, P), lambda i: (i, 0, 0)),
                _full_spec(wc9), _full_spec(cb)]
    for w, b in zip(fc_ws, fc_bs):
        inputs += [w, b]
        in_specs += [_full_spec(w), _full_spec(b)]

    total_in_bytes = sum(int(a.size) * a.dtype.itemsize for a in inputs)
    vmem_limit = int(min(96 * 2**20, max(16 * 2**20, 4 * total_in_bytes)))

    # Advisory cost hint for the XLA scheduler.
    flops = 2 * N * OC * 9 * P
    trans = 0
    for i, (w, b) in enumerate(zip(fc_ws, fc_bs)):
        F = OC * P if i == 0 else w.shape[0]
        O = b.shape[1]
        flops += 2 * N * F * O
        if i < n_fc - 1:
            trans += N * O
    cost = pl.CostEstimate(flops=int(flops), transcendentals=int(trans),
                           bytes_accessed=int(total_in_bytes + N * OUT * 4))

    out = pl.pallas_call(
        functools.partial(fused_net_kernel, n_fc=n_fc),
        out_shape=jax.ShapeDtypeStruct((N, 1, OUT), jnp.float32),
        grid=grid,
        in_specs=in_specs,
        out_specs=pl.BlockSpec((block_n, 1, OUT), lambda i: (i, 0, 0)),
        compiler_params=pltpu.CompilerParams(
            dimension_semantics=("parallel",),
            vmem_limit_bytes=vmem_limit),
        cost_estimate=cost,
    )(*inputs)
    return out[:, 0, :]                                       # (N, OUT)


def forward(prep, x):
    """x: (N, 1, H, W) f32 NCHW -> (N, output_size) f32."""
    N, C, H, W = x.shape
    assert C == 1
    Ho, Wo = H - 2, W - 2
    P = Ho * Wo
    xs = x[:, 0]                                              # (N, H, W)
    # Tiny im2col prep in XLA (lane-dense (9, Ho*Wo) patches per image); everything
    # else (conv, ReLU, flatten, FC stack) runs inside the single fused Pallas kernel.
    patches = jnp.stack(
        [xs[:, kh:kh + Ho, kw:kw + Wo].reshape(N, P)
         for kh in range(3) for kw in range(3)], axis=1)      # (N, 9, P)
    return fused_forward(patches, prep)


# ------------------------------- parameter handling -------------------------------

def init_params(key, input_size, output_size, layers):
    """Deterministic synthetic parameters in PyTorch layout / shapes."""
    H, W = input_size
    OC = 8
    conv_out = OC * (H - 2) * (W - 2)       # == _get_conv_output_size for 1-channel input
    dims = [conv_out] + list(layers) + [output_size]

    keys = jax.random.split(key, 2 + 2 * (len(dims) - 1))
    params = {
        "conv_w": 0.1 * jax.random.normal(keys[0], (OC, 1, 3, 3), jnp.float32),
        "conv_b": 0.1 * jax.random.normal(keys[1], (OC,), jnp.float32),
        "fc_w": [],
        "fc_b": [],
    }
    for i in range(len(dims) - 1):
        scale = 1.0 / jnp.sqrt(jnp.float32(dims[i]))
        params["fc_w"].append(
            scale * jax.random.normal(keys[2 + 2 * i], (dims[i + 1], dims[i]), jnp.float32))
        params["fc_b"].append(
            scale * jax.random.normal(keys[3 + 2 * i], (dims[i + 1],), jnp.float32))
    return params


def prepare_kernel_params(params):
    """One-time relayout/cast (hoisted out of forward): conv weight -> (OC, 9);
    first FC weight -> (OC, Ho*Wo, O1) with the NCHW flatten folded in; other FC
    weights transposed to (F, O); FC weights in bf16, biases/conv in f32."""
    conv_w, conv_b = params["conv_w"], params["conv_b"]
    OC = conv_w.shape[0]
    prep = {
        "wc9": conv_w.reshape(OC, 9).astype(jnp.float32),
        "cb": conv_b.reshape(OC, 1).astype(jnp.float32),
        "fc_w": [],
        "fc_b": [],
    }
    w1 = params["fc_w"][0]
    O1, F1 = w1.shape
    P = F1 // OC
    prep["fc_w"].append(
        jnp.transpose(w1.reshape(O1, OC, P), (1, 2, 0)).astype(jnp.bfloat16))  # (OC,P,O1)
    prep["fc_b"].append(params["fc_b"][0].reshape(1, O1).astype(jnp.float32))
    for w, b in zip(params["fc_w"][1:], params["fc_b"][1:]):
        prep["fc_w"].append(jnp.transpose(w).astype(jnp.bfloat16))             # (F, O)
        prep["fc_b"].append(b.reshape(1, -1).astype(jnp.float32))
    return prep


# ------------------------------------- main -------------------------------------

if __name__ == "__main__":
    key = jax.random.PRNGKey(0)
    kp, kx = jax.random.split(key)

    input_size = (16, 16)          # (H, W)
    output_size = 8
    layers = [128, 64, 32]         # small stand-in for the default [1000, 500, 200]

    params = init_params(kp, input_size, output_size, layers)
    prep = prepare_kernel_params(params)     # transpose / reshape / bf16-cast ONCE

    x = jax.random.normal(kx, (2, 1, input_size[0], input_size[1]), jnp.float32)  # NCHW

    fwd = jax.jit(forward)
    out = jax.block_until_ready(fwd(prep, x))
    assert out.shape == (2, output_size), out.shape
    assert out.dtype == jnp.float32
    print("KERNEL_OK")
</pallas_src>

<mosaic_0001>
module attributes {stable_mosaic.version = 11 : i64} {
  func.func @fused_net_kernel(%arg0: i32, %arg1: memref<1x9x196xf32, #tpu.memory_space<vmem>>, %arg2: memref<8x9xf32, #tpu.memory_space<vmem>>, %arg3: memref<8x1xf32, #tpu.memory_space<vmem>>, %arg4: memref<8x196x128xbf16, #tpu.memory_space<vmem>>, %arg5: memref<1x128xf32, #tpu.memory_space<vmem>>, %arg6: memref<128x64xbf16, #tpu.memory_space<vmem>>, %arg7: memref<1x64xf32, #tpu.memory_space<vmem>>, %arg8: memref<64x32xbf16, #tpu.memory_space<vmem>>, %arg9: memref<1x32xf32, #tpu.memory_space<vmem>>, %arg10: memref<32x8xbf16, #tpu.memory_space<vmem>>, %arg11: memref<1x8xf32, #tpu.memory_space<vmem>>, %arg12: memref<1x1x8xf32, #tpu.memory_space<vmem>>) attributes {dimension_semantics = [#tpu.dimension_semantics<parallel>], iteration_bounds = array<i64: 2>, scalar_prefetch = 0 : i64, scratch_operands = 0 : i64, tpu.core_type = #tpu.core_type<tc>, window_params = [{transform_indices = @transform_0, window_bounds = array<i64: 1, 9, 196>}, {pipeline_mode = #tpu.pipeline_mode<synchronous>, transform_indices = @transform_1, window_bounds = array<i64: 8, 9>}, {pipeline_mode = #tpu.pipeline_mode<synchronous>, transform_indices = @transform_2, window_bounds = array<i64: 8, 1>}, {pipeline_mode = #tpu.pipeline_mode<synchronous>, transform_indices = @transform_3, window_bounds = array<i64: 8, 196, 128>}, {pipeline_mode = #tpu.pipeline_mode<synchronous>, transform_indices = @transform_4, window_bounds = array<i64: 1, 128>}, {pipeline_mode = #tpu.pipeline_mode<synchronous>, transform_indices = @transform_5, window_bounds = array<i64: 128, 64>}, {pipeline_mode = #tpu.pipeline_mode<synchronous>, transform_indices = @transform_6, window_bounds = array<i64: 1, 64>}, {pipeline_mode = #tpu.pipeline_mode<synchronous>, transform_indices = @transform_7, window_bounds = array<i64: 64, 32>}, {pipeline_mode = #tpu.pipeline_mode<synchronous>, transform_indices = @transform_8, window_bounds = array<i64: 1, 32>}, {pipeline_mode = #tpu.pipeline_mode<synchronous>, transform_indices = @transform_9, window_bounds = array<i64: 32, 8>}, {pipeline_mode = #tpu.pipeline_mode<synchronous>, transform_indices = @transform_10, window_bounds = array<i64: 1, 8>}, {transform_indices = @transform_11, window_bounds = array<i64: 1, 1, 8>}]} {
    %c0 = arith.constant 0 : index
    %c0_0 = arith.constant 0 : index
    %0 = vector.load %arg2[%c0, %c0_0] : memref<8x9xf32, #tpu.memory_space<vmem>>, vector<8x9xf32>
    %c0_1 = arith.constant 0 : index
    %c0_2 = arith.constant 0 : index
    %c0_3 = arith.constant 0 : index
    %1 = vector.load %arg1[%c0_1, %c0_2, %c0_3] : memref<1x9x196xf32, #tpu.memory_space<vmem>>, vector<1x9x196xf32>
    %2 = vector.shape_cast %1 : vector<1x9x196xf32> to vector<9x196xf32>
    %cst = arith.constant dense<0.000000e+00> : vector<8x196xf32>
    %3 = tpu.matmul %0, %2, %cst {dimension_numbers = #tpu.dot_dimension_numbers<[1], [0], [0], [1], [0, 0, 1, 1], [], []>} : vector<8x9xf32>, vector<9x196xf32>, vector<8x196xf32> -> vector<8x196xf32>
    %c0_4 = arith.constant 0 : index
    %c0_5 = arith.constant 0 : index
    %4 = vector.load %arg3[%c0_4, %c0_5] : memref<8x1xf32, #tpu.memory_space<vmem>>, vector<8x1xf32>
    %5 = vector.broadcast %4 : vector<8x1xf32> to vector<8x196xf32>
    %6 = arith.addf %3, %5 : vector<8x196xf32>
    %cst_6 = arith.constant 0.000000e+00 : f32
    %7 = vector.broadcast %cst_6 : f32 to vector<8x196xf32>
    %8 = arith.maximumf %6, %7 : vector<8x196xf32>
    %9 = arith.truncf %8 : vector<8x196xf32> to vector<8x196xbf16>
    %cst_7 = arith.constant 0.000000e+00 : f32
    %10 = vector.broadcast %cst_7 : f32 to vector<1x128xf32>
    %11 = vector.extract_strided_slice %9 {offsets = [0, 0], sizes = [1, 196], strides = [1, 1]} : vector<8x196xbf16> to vector<1x196xbf16>
    %c0_8 = arith.constant 0 : index
    %c0_9 = arith.constant 0 : index
    %c0_10 = arith.constant 0 : index
    %12 = vector.load %arg4[%c0_8, %c0_9, %c0_10] : memref<8x196x128xbf16, #tpu.memory_space<vmem>>, vector<1x196x128xbf16>
    %13 = vector.shape_cast %12 : vector<1x196x128xbf16> to vector<196x128xbf16>
    %cst_11 = arith.constant dense<0.000000e+00> : vector<1x128xf32>
    %14 = tpu.matmul %11, %13, %cst_11 {dimension_numbers = #tpu.dot_dimension_numbers<[1], [0], [0], [1], [0, 0, 1, 1], [], []>} : vector<1x196xbf16>, vector<196x128xbf16>, vector<1x128xf32> -> vector<1x128xf32>
    %15 = arith.addf %10, %14 : vector<1x128xf32>
    %16 = vector.extract_strided_slice %9 {offsets = [1, 0], sizes = [1, 196], strides = [1, 1]} : vector<8x196xbf16> to vector<1x196xbf16>
    %c1 = arith.constant 1 : index
    %c0_12 = arith.constant 0 : index
    %c0_13 = arith.constant 0 : index
    %17 = vector.load %arg4[%c1, %c0_12, %c0_13] : memref<8x196x128xbf16, #tpu.memory_space<vmem>>, vector<1x196x128xbf16>
    %18 = vector.shape_cast %17 : vector<1x196x128xbf16> to vector<196x128xbf16>
    %cst_14 = arith.constant dense<0.000000e+00> : vector<1x128xf32>
    %19 = tpu.matmul %16, %18, %cst_14 {dimension_numbers = #tpu.dot_dimension_numbers<[1], [0], [0], [1], [0, 0, 1, 1], [], []>} : vector<1x196xbf16>, vector<196x128xbf16>, vector<1x128xf32> -> vector<1x128xf32>
    %20 = arith.addf %15, %19 : vector<1x128xf32>
    %21 = vector.extract_strided_slice %9 {offsets = [2, 0], sizes = [1, 196], strides = [1, 1]} : vector<8x196xbf16> to vector<1x196xbf16>
    %c2 = arith.constant 2 : index
    %c0_15 = arith.constant 0 : index
    %c0_16 = arith.constant 0 : index
    %22 = vector.load %arg4[%c2, %c0_15, %c0_16] : memref<8x196x128xbf16, #tpu.memory_space<vmem>>, vector<1x196x128xbf16>
    %23 = vector.shape_cast %22 : vector<1x196x128xbf16> to vector<196x128xbf16>
    %cst_17 = arith.constant dense<0.000000e+00> : vector<1x128xf32>
    %24 = tpu.matmul %21, %23, %cst_17 {dimension_numbers = #tpu.dot_dimension_numbers<[1], [0], [0], [1], [0, 0, 1, 1], [], []>} : vector<1x196xbf16>, vector<196x128xbf16>, vector<1x128xf32> -> vector<1x128xf32>
    %25 = arith.addf %20, %24 : vector<1x128xf32>
    %26 = vector.extract_strided_slice %9 {offsets = [3, 0], sizes = [1, 196], strides = [1, 1]} : vector<8x196xbf16> to vector<1x196xbf16>
    %c3 = arith.constant 3 : index
    %c0_18 = arith.constant 0 : index
    %c0_19 = arith.constant 0 : index
    %27 = vector.load %arg4[%c3, %c0_18, %c0_19] : memref<8x196x128xbf16, #tpu.memory_space<vmem>>, vector<1x196x128xbf16>
    %28 = vector.shape_cast %27 : vector<1x196x128xbf16> to vector<196x128xbf16>
    %cst_20 = arith.constant dense<0.000000e+00> : vector<1x128xf32>
    %29 = tpu.matmul %26, %28, %cst_20 {dimension_numbers = #tpu.dot_dimension_numbers<[1], [0], [0], [1], [0, 0, 1, 1], [], []>} : vector<1x196xbf16>, vector<196x128xbf16>, vector<1x128xf32> -> vector<1x128xf32>
    %30 = arith.addf %25, %29 : vector<1x128xf32>
    %31 = vector.extract_strided_slice %9 {offsets = [4, 0], sizes = [1, 196], strides = [1, 1]} : vector<8x196xbf16> to vector<1x196xbf16>
    %c4 = arith.constant 4 : index
    %c0_21 = arith.constant 0 : index
    %c0_22 = arith.constant 0 : index
    %32 = vector.load %arg4[%c4, %c0_21, %c0_22] : memref<8x196x128xbf16, #tpu.memory_space<vmem>>, vector<1x196x128xbf16>
    %33 = vector.shape_cast %32 : vector<1x196x128xbf16> to vector<196x128xbf16>
    %cst_23 = arith.constant dense<0.000000e+00> : vector<1x128xf32>
    %34 = tpu.matmul %31, %33, %cst_23 {dimension_numbers = #tpu.dot_dimension_numbers<[1], [0], [0], [1], [0, 0, 1, 1], [], []>} : vector<1x196xbf16>, vector<196x128xbf16>, vector<1x128xf32> -> vector<1x128xf32>
    %35 = arith.addf %30, %34 : vector<1x128xf32>
    %36 = vector.extract_strided_slice %9 {offsets = [5, 0], sizes = [1, 196], strides = [1, 1]} : vector<8x196xbf16> to vector<1x196xbf16>
    %c5 = arith.constant 5 : index
    %c0_24 = arith.constant 0 : index
    %c0_25 = arith.constant 0 : index
    %37 = vector.load %arg4[%c5, %c0_24, %c0_25] : memref<8x196x128xbf16, #tpu.memory_space<vmem>>, vector<1x196x128xbf16>
    %38 = vector.shape_cast %37 : vector<1x196x128xbf16> to vector<196x128xbf16>
    %cst_26 = arith.constant dense<0.000000e+00> : vector<1x128xf32>
    %39 = tpu.matmul %36, %38, %cst_26 {dimension_numbers = #tpu.dot_dimension_numbers<[1], [0], [0], [1], [0, 0, 1, 1], [], []>} : vector<1x196xbf16>, vector<196x128xbf16>, vector<1x128xf32> -> vector<1x128xf32>
    %40 = arith.addf %35, %39 : vector<1x128xf32>
    %41 = vector.extract_strided_slice %9 {offsets = [6, 0], sizes = [1, 196], strides = [1, 1]} : vector<8x196xbf16> to vector<1x196xbf16>
    %c6 = arith.constant 6 : index
    %c0_27 = arith.constant 0 : index
    %c0_28 = arith.constant 0 : index
    %42 = vector.load %arg4[%c6, %c0_27, %c0_28] : memref<8x196x128xbf16, #tpu.memory_space<vmem>>, vector<1x196x128xbf16>
    %43 = vector.shape_cast %42 : vector<1x196x128xbf16> to vector<196x128xbf16>
    %cst_29 = arith.constant dense<0.000000e+00> : vector<1x128xf32>
    %44 = tpu.matmul %41, %43, %cst_29 {dimension_numbers = #tpu.dot_dimension_numbers<[1], [0], [0], [1], [0, 0, 1, 1], [], []>} : vector<1x196xbf16>, vector<196x128xbf16>, vector<1x128xf32> -> vector<1x128xf32>
    %45 = arith.addf %40, %44 : vector<1x128xf32>
    %46 = vector.extract_strided_slice %9 {offsets = [7, 0], sizes = [1, 196], strides = [1, 1]} : vector<8x196xbf16> to vector<1x196xbf16>
    %c7 = arith.constant 7 : index
    %c0_30 = arith.constant 0 : index
    %c0_31 = arith.constant 0 : index
    %47 = vector.load %arg4[%c7, %c0_30, %c0_31] : memref<8x196x128xbf16, #tpu.memory_space<vmem>>, vector<1x196x128xbf16>
    %48 = vector.shape_cast %47 : vector<1x196x128xbf16> to vector<196x128xbf16>
    %cst_32 = arith.constant dense<0.000000e+00> : vector<1x128xf32>
    %49 = tpu.matmul %46, %48, %cst_32 {dimension_numbers = #tpu.dot_dimension_numbers<[1], [0], [0], [1], [0, 0, 1, 1], [], []>} : vector<1x196xbf16>, vector<196x128xbf16>, vector<1x128xf32> -> vector<1x128xf32>
    %50 = arith.addf %45, %49 : vector<1x128xf32>
    %c0_33 = arith.constant 0 : index
    %c0_34 = arith.constant 0 : index
    %51 = vector.load %arg5[%c0_33, %c0_34] : memref<1x128xf32, #tpu.memory_space<vmem>>, vector<1x128xf32>
    %52 = arith.addf %50, %51 : vector<1x128xf32>
    %53 = arith.negf %52 : vector<1x128xf32>
    %54 = math.exp %53 : vector<1x128xf32>
    %cst_35 = arith.constant 1.000000e+00 : f32
    %55 = vector.broadcast %cst_35 : f32 to vector<1x128xf32>
    %56 = arith.addf %55, %54 : vector<1x128xf32>
    %57 = arith.divf %55, %56 : vector<1x128xf32>
    %58 = arith.truncf %57 : vector<1x128xf32> to vector<1x128xbf16>
    %c0_36 = arith.constant 0 : index
    %c0_37 = arith.constant 0 : index
    %59 = vector.load %arg6[%c0_36, %c0_37] : memref<128x64xbf16, #tpu.memory_space<vmem>>, vector<128x64xbf16>
    %cst_38 = arith.constant dense<0.000000e+00> : vector<1x64xf32>
    %60 = tpu.matmul %58, %59, %cst_38 {dimension_numbers = #tpu.dot_dimension_numbers<[1], [0], [0], [1], [0, 0, 1, 1], [], []>} : vector<1x128xbf16>, vector<128x64xbf16>, vector<1x64xf32> -> vector<1x64xf32>
    %c0_39 = arith.constant 0 : index
    %c0_40 = arith.constant 0 : index
    %61 = vector.load %arg7[%c0_39, %c0_40] : memref<1x64xf32, #tpu.memory_space<vmem>>, vector<1x64xf32>
    %62 = arith.addf %60, %61 : vector<1x64xf32>
    %63 = arith.negf %62 : vector<1x64xf32>
    %64 = math.exp %63 : vector<1x64xf32>
    %cst_41 = arith.constant 1.000000e+00 : f32
    %65 = vector.broadcast %cst_41 : f32 to vector<1x64xf32>
    %66 = arith.addf %65, %64 : vector<1x64xf32>
    %67 = arith.divf %65, %66 : vector<1x64xf32>
    %68 = arith.truncf %67 : vector<1x64xf32> to vector<1x64xbf16>
    %c0_42 = arith.constant 0 : index
    %c0_43 = arith.constant 0 : index
    %69 = vector.load %arg8[%c0_42, %c0_43] : memref<64x32xbf16, #tpu.memory_space<vmem>>, vector<64x32xbf16>
    %cst_44 = arith.constant dense<0.000000e+00> : vector<1x32xf32>
    %70 = tpu.matmul %68, %69, %cst_44 {dimension_numbers = #tpu.dot_dimension_numbers<[1], [0], [0], [1], [0, 0, 1, 1], [], []>} : vector<1x64xbf16>, vector<64x32xbf16>, vector<1x32xf32> -> vector<1x32xf32>
    %c0_45 = arith.constant 0 : index
    %c0_46 = arith.constant 0 : index
    %71 = vector.load %arg9[%c0_45, %c0_46] : memref<1x32xf32, #tpu.memory_space<vmem>>, vector<1x32xf32>
    %72 = arith.addf %70, %71 : vector<1x32xf32>
    %73 = arith.negf %72 : vector<1x32xf32>
    %74 = math.exp %73 : vector<1x32xf32>
    %cst_47 = arith.constant 1.000000e+00 : f32
    %75 = vector.broadcast %cst_47 : f32 to vector<1x32xf32>
    %76 = arith.addf %75, %74 : vector<1x32xf32>
    %77 = arith.divf %75, %76 : vector<1x32xf32>
    %78 = arith.truncf %77 : vector<1x32xf32> to vector<1x32xbf16>
    %c0_48 = arith.constant 0 : index
    %c0_49 = arith.constant 0 : index
    %79 = vector.load %arg10[%c0_48, %c0_49] : memref<32x8xbf16, #tpu.memory_space<vmem>>, vector<32x8xbf16>
    %cst_50 = arith.constant dense<0.000000e+00> : vector<1x8xf32>
    %80 = tpu.matmul %78, %79, %cst_50 {dimension_numbers = #tpu.dot_dimension_numbers<[1], [0], [0], [1], [0, 0, 1, 1], [], []>} : vector<1x32xbf16>, vector<32x8xbf16>, vector<1x8xf32> -> vector<1x8xf32>
    %c0_51 = arith.constant 0 : index
    %c0_52 = arith.constant 0 : index
    %81 = vector.load %arg11[%c0_51, %c0_52] : memref<1x8xf32, #tpu.memory_space<vmem>>, vector<1x8xf32>
    %82 = arith.addf %80, %81 : vector<1x8xf32>
    %83 = vector.shape_cast %82 : vector<1x8xf32> to vector<1x1x8xf32>
    %c0_53 = arith.constant 0 : index
    %c0_54 = arith.constant 0 : index
    %c0_55 = arith.constant 0 : index
    %84 = vector.load %arg12[%c0_53, %c0_54, %c0_55] : memref<1x1x8xf32, #tpu.memory_space<vmem>>, vector<1x1x8xf32>
    tpu.vector_store %arg12[%c0_53, %c0_54, %c0_55], %83 {strides = array<i32>} : memref<1x1x8xf32, #tpu.memory_space<vmem>>, vector<1x1x8xf32>,
    return
  }
  func.func @transform_0(%arg0: i32) -> (i32, i32, i32) {
    %c0_i32 = arith.constant 0 : i32
    %c0_i32_0 = arith.constant 0 : i32
    %c0_i32_1 = arith.constant 0 : i32
    return %arg0, %c0_i32, %c0_i32_0 : i32, i32, i32
  }
  func.func @transform_1(%arg0: i32) -> (i32, i32) {
    %c0_i32 = arith.constant 0 : i32
    %c0_i32_0 = arith.constant 0 : i32
    %c0_i32_1 = arith.constant 0 : i32
    return %c0_i32, %c0_i32_0 : i32, i32
  }
  func.func @transform_2(%arg0: i32) -> (i32, i32) {
    %c0_i32 = arith.constant 0 : i32
    %c0_i32_0 = arith.constant 0 : i32
    %c0_i32_1 = arith.constant 0 : i32
    return %c0_i32, %c0_i32_0 : i32, i32
  }
  func.func @transform_3(%arg0: i32) -> (i32, i32, i32) {
    %c0_i32 = arith.constant 0 : i32
    %c0_i32_0 = arith.constant 0 : i32
    %c0_i32_1 = arith.constant 0 : i32
    %c0_i32_2 = arith.constant 0 : i32
    return %c0_i32, %c0_i32_0, %c0_i32_1 : i32, i32, i32
  }
  func.func @transform_4(%arg0: i32) -> (i32, i32) {
    %c0_i32 = arith.constant 0 : i32
    %c0_i32_0 = arith.constant 0 : i32
    %c0_i32_1 = arith.constant 0 : i32
    return %c0_i32, %c0_i32_0 : i32, i32
  }
  func.func @transform_5(%arg0: i32) -> (i32, i32) {
    %c0_i32 = arith.constant 0 : i32
    %c0_i32_0 = arith.constant 0 : i32
    %c0_i32_1 = arith.constant 0 : i32
    return %c0_i32, %c0_i32_0 : i32, i32
  }
  func.func @transform_6(%arg0: i32) -> (i32, i32) {
    %c0_i32 = arith.constant 0 : i32
    %c0_i32_0 = arith.constant 0 : i32
    %c0_i32_1 = arith.constant 0 : i32
    return %c0_i32, %c0_i32_0 : i32, i32
  }
  func.func @transform_7(%arg0: i32) -> (i32, i32) {
    %c0_i32 = arith.constant 0 : i32
    %c0_i32_0 = arith.constant 0 : i32
    %c0_i32_1 = arith.constant 0 : i32
    return %c0_i32, %c0_i32_0 : i32, i32
  }
  func.func @transform_8(%arg0: i32) -> (i32, i32) {
    %c0_i32 = arith.constant 0 : i32
    %c0_i32_0 = arith.constant 0 : i32
    %c0_i32_1 = arith.constant 0 : i32
    return %c0_i32, %c0_i32_0 : i32, i32
  }
  func.func @transform_9(%arg0: i32) -> (i32, i32) {
    %c0_i32 = arith.constant 0 : i32
    %c0_i32_0 = arith.constant 0 : i32
    %c0_i32_1 = arith.constant 0 : i32
    return %c0_i32, %c0_i32_0 : i32, i32
  }
  func.func @transform_10(%arg0: i32) -> (i32, i32) {
    %c0_i32 = arith.constant 0 : i32
    %c0_i32_0 = arith.constant 0 : i32
    %c0_i32_1 = arith.constant 0 : i32
    return %c0_i32, %c0_i32_0 : i32, i32
  }
  func.func @transform_11(%arg0: i32) -> (i32, i32, i32) {
    %c0_i32 = arith.constant 0 : i32
    %c0_i32_0 = arith.constant 0 : i32
    %c0_i32_1 = arith.constant 0 : i32
    return %arg0, %c0_i32, %c0_i32_0 : i32, i32, i32
  }
}

</mosaic_0001>

<bundles_post_ra>
// kernel: forward.1
= control target key start
LH: loop header
LB: loop body
LE: loop exit
PB: predicated region body
PF: predicated region fallthrough
CT: control target
= control target key end

     0   :  { %16 = vsyncpa [#allocation3], 0  ;;  %s3352_s0 = inlined_call_operand.vmem [shape: f32[2,9,196], index: 0, kind: input, shape index: {}]   ;;  %s3353_s1 = inlined_call_operand.vmem [shape: f32[8,9], index: 1, kind: input, shape index: {}]   ;;  %s3354_s2 = inlined_call_operand.vmem [shape: f32[8,1], index: 2, kind: input, shape index: {}]   ;;  %s3355_s3 = inlined_call_operand.vmem [shape: bf16[8,196,128], index: 3, kind: input, shape index: {}]   ;;  %s3356_s4 = inlined_call_operand.vmem [shape: f32[1,128], index: 4, kind: input, shape index: {}]   ;;  %s3357_s5 = inlined_call_operand.vmem [shape: bf16[128,64], index: 5, kind: input, shape index: {}]   ;;  %s3358_s6 = inlined_call_operand.vmem [shape: f32[1,64], index: 6, kind: input, shape index: {}]   ;;  %s3359_s7 = inlined_call_operand.vmem [shape: bf16[64,32], index: 7, kind: input, shape index: {}]   ;;  %s3360_s8 = inlined_call_operand.vmem [shape: f32[1,32], index: 8, kind: input, shape index: {}]   ;;  %s3361_s9 = inlined_call_operand.vmem [shape: bf16[32,8], index: 9, kind: input, shape index: {}]   ;;  %s3362_s10 = inlined_call_operand.vmem [shape: f32[1,8], index: 10, kind: input, shape index: {}]   ;;  %s3363_s11 = inlined_call_operand.hbm [shape: f32[2,1,8], index: 11, kind: output, shape index: {}]  }
   0x1   :  { %18 = vsyncpa [#allocation3 + $0x1], 0  ;;  %s2712_s17 = smov 0   ;;  %s2714_s18 = smov 0  }
   0x2   :  { %s2716_s19 = smov 0   ;;  %s2718_s20 = smov 0  }
   0x3 LB: > { %s2733_s21 = sadd.s32 4294967295, %s2645_s20   ;;  %s2027_s22 = sadd.s32 4294967294, %s2645_s20   ;;  %s2645_s20 = sphi %s2718_s20, %s3369_s20   ;;  %s2641_s19 = sphi %s2716_s19, %s3368_s19   ;;  %s2637_s18 = sphi %s2714_s18, %s3367_s18   ;;  %s2633_s17 = sphi %s2712_s17, %s3366_s17  }
   0x4   : > { %s2737_s23 = sadd.s32 1, %s2645_s20   ;;  %s267_s24 = sadd.s32 1, %s2641_s19 }
   0x5   : > { %s264_s25 = ssub.s32 %s2645_s20, %s2737_s23  ;;  %p277_p0 = scmp.ne.s32.totalorder %s2641_s19, %s2637_s18 }
   0x6   : > { %p265_p1 = scmp.eq.s32.totalorder %s264_s25, 0  ;;  %p278_p2 = scmp.eq.s32.totalorder %s2733_s21, 1 }
   0x7   : > { %p283_p3 = scmp.ne.s32.totalorder %s2637_s18, %s2633_s17  ;;  %p284_p4 = scmp.eq.s32.totalorder %s2027_s22, 1 }
   0x8   : > { %s2748_s26 = scalar_select %p265_p1, %s2641_s19, %s267_s24  }
   0x9   : > { %p2750_p5 = por %p278_p2, %p277_p0  ;;  %p2754_p6 = por %p284_p4, %p283_p3 }
   0xa   : > { %p2030_p7 = scmp.ge.s32.totalorder %s2645_s20, 1  ;;  %p340_p8 = scmp.lt.s32.totalorder %s2645_s20, 3 }
   0xc   : > { %p341_p9 = pnand %p2030_p7, %p340_p8 }
   0xd   : > { %p379_p10 = scmp.lt.s32.totalorder (!%p341_p9), %s2733_s21, 1  ;;  %vm400_vm0 = vcmask (!%p341_p9), 1040384   ;;  %v2647_v0 = vmov (!%p341_p9), 0.0   ;;  %v390_v1 = vld [vmem:[%s3354_s2] sm:$0xff] (!%p341_p9)  ;;  %v2648_v2 = vmov (!%p341_p9), 0   ;;  %vm2649_vm1 = vmmov (!%p341_p9), 1  }
   0xe   : > { %344 = sbr.rel (%p341_p9) target bundleno = 1368 (0x558), region = 64  ;;  %471 = vmatprep.mubr.f32.mxu0 (!%p341_p9), %v2647_v0  ;;  %2452 = vset.pattern.permute.xlu0 (!%p341_p9), %v2648_v2  ;;  %v2454_v3 = vld [vmem:[%s3355_s3 + $0x64] sm:$0xff] (!%p341_p9)   ;;  %vm2404_vm2 = vmpackc.low (!%p341_p9), %vm400_vm0, %vm2649_vm1  ;;  %v2456_v4 = vld [vmem:[%s3355_s3 + $0x6c] sm:$0xff] (!%p341_p9)   ;;  %vm396_vm3 = vcmask (!%p341_p9), 72704   ;;  %vm619_vm4 = vcmask (!%p341_p9), 1041408   ;;  %vm615_vm5 = vcmask (!%p341_p9), 556032  }
   0xf   : > { %623 = vmatprep.subr.bf16.mxu1 (!%p341_p9), %v2648_v2  ;;  %393 = vperm.xlu0 (!%p341_p9), %2452, %v390_v1   ;;  %v385_v11 = vld [vmem:[%s3353_s1] sm:$0xff] (!%p341_p9)  ;;  %v2458_v12 = vld [vmem:[%s3355_s3 + $0x74] sm:$0xff] (!%p341_p9)   ;;  %v2455_v15 = vld [vmem:[%s3355_s3 + $0x8] sm:$0xff] (!%p341_p9)   ;;  %vm2650_vm6 = vmmov (!%p341_p9), 0   ;;  %vm1845_vm7 = vcmask (!%p341_p9), 523264   ;;  %vm1913_vm8 = vcmask (!%p341_p9), 261120  }
  0x10   : > { %624 = vmatpush1.bf16.msra.mxu1 (!%p341_p9), %v2454_v3  ;;  %v2453_v13 = vld [vmem:[%s3355_s3] sm:$0xff] (!%p341_p9)   ;;  %v2457_v17 = vld [vmem:[%s3355_s3 + $0x10] sm:$0xff] (!%p341_p9)   ;;  %v2459_v19 = vld [vmem:[%s3355_s3 + $0x18] sm:$0xff] (!%p341_p9)   ;;  %s377_s30 = sand.u32 (!%p341_p9), 1, %s2637_s18   ;;  %s2342_s14 = sshll.u32 (!%p341_p9), %s2733_s21, 4  ;;  %vm1957_vm9 = vcmask (!%p341_p9), 57344  }
  0x11   : > { %625 = vmatprep.subr.bf16.mxu1 (!%p341_p9), %v2648_v2  ;;  %v2460_v14 = vld [vmem:[%s3355_s3 + $0x7c] sm:$0xff] (!%p341_p9)   ;;  %v2462_v16 = vld [vmem:[%s3355_s3 + $0x84] sm:$0xff] (!%p341_p9)   ;;  %v2464_v18 = vld [vmem:[%s3355_s3 + $0x8c] sm:$0xff] (!%p341_p9)   ;;  %s3310_s25 = scalar_lea.hbm (!%p341_p9), %s3363_s11, %s2342_s14 }
  0x12   : > { %v2461_v20 = vld [vmem:[%s3355_s3 + $0x20] sm:$0xff] (!%p341_p9)   ;;  %v2466_v21 = vld [vmem:[%s3355_s3 + $0x94] sm:$0xff] (!%p341_p9)   ;;  %v2463_v23 = vld [vmem:[%s3355_s3 + $0x28] sm:$0xff] (!%p341_p9)  }
  0x13   : > { %v2468_v22 = vld [vmem:[%s3355_s3 + $0x9c] sm:$0xff] (!%p341_p9)   ;;  %v2470_v24 = vld [vmem:[%s3355_s3 + $0xa4] sm:$0xff] (!%p341_p9)   ;;  %v2465_v25 = vld [vmem:[%s3355_s3 + $0x30] sm:$0xff] (!%p341_p9)  }
  0x14   : > { %626 = vmatpush1.bf16.msra.mxu1 (!%p341_p9), %v2456_v4  ;;  %v2472_v26 = vld [vmem:[%s3355_s3 + $0xac] sm:$0xff] (!%p341_p9)   ;;  %v2467_v27 = vld [vmem:[%s3355_s3 + $0x38] sm:$0xff] (!%p341_p9)   ;;  %v2469_v29 = vld [vmem:[%s3355_s3 + $0x40] sm:$0xff] (!%p341_p9)  }
  0x15   : > { %s380_s12 = scalar_select %p379_p10, %s2733_s21, 1  ;;  %627 = vmatprep.subr.bf16.mxu1 %v2648_v2  ;;  %v2474_v28 = vld [vmem:[%s3355_s3 + $0xb4] sm:$0xff]   ;;  %v2471_v30 = vld [vmem:[%s3355_s3 + $0x48] sm:$0xff]   ;;  %v2476_v33 = vld [vmem:[%s3355_s3 + $0xbc] sm:$0xff]  }
  0x16   : > { %v2473_v31 = vld [vmem:[%s3355_s3 + $0x50] sm:$0xff]   ;;  %v2475_v32 = vld [vmem:[%s3355_s3 + $0x58] sm:$0xff]   ;;  %v2477_v34 = vld [vmem:[%s3355_s3 + $0x60] ss:$0 sps:$4 sm:$0x33]   ;;  %s1960_s21 = scalar_lea.sflag [#allocation3], %s377_s30 }
  0x17   : > { %s2345_s15 = sshll.u32 %s380_s12, 5  ;;  %v741_v35 = vsel %vm619_vm4, %v2477_v34, 0  ;;  %v2478_v36 = vld [vmem:[%s3355_s3 + $0xc4] ss:$0 sps:$4 sm:$0x33]   ;;  %v2479_v47 = vld [vmem:[%s3355_s3 + $0x12c] sm:$0xff]  }
  0x18   : > { %s383_s24 = scalar_lea.vmem %s3352_s0, %s2345_s15  ;;  %628 = vmatpush1.bf16.msra.mxu1 %v2458_v12  ;;  %v621_v37 = vsel %vm619_vm4, %v2478_v36, 0  ;;  %v2480_v49 = vld [vmem:[%s3355_s3 + $0xc8] sm:$0xff]   ;;  %v2481_v53 = vld [vmem:[%s3355_s3 + $0x134] sm:$0xff]   ;;  %v2483_v55 = vld [vmem:[%s3355_s3 + $0x13c] sm:$0xff]   ;;  %s378_s15 = scalar_lea.vmem [#allocation2], %s377_s30 }
  0x19   : > { %v387_v5 = vld [vmem:[%s383_s24 + $0x8] sm:$0xff]  ;;  %v389_v6 = vld [vmem:[%s383_s24 + $0x18] sm:$0x1]  ;;  %v386_v7 = vld [vmem:[%s383_s24] sm:$0xff]  ;;  %629 = vmatprep.subr.bf16.mxu1 %v2648_v2  ;;  %s1972_s16 = sshll.u32 %s378_s15, 4  ;;  %s2651_s12 = smov [#allocation2]   ;;  %s3312_s16 = int_to_ptr.vmem [resolvable:$true] %s1972_s16 }
  0x1a   : > { %v2403_v8 = vpack.c.bf16 %v389_v6, %v387_v5  ;;  %v388_v9 = vld [vmem:[%s383_s24 + $0x10] sm:$0x1]  ;;  %v2484_v56 = vld [vmem:[%s3355_s3 + $0xd8] sm:$0xff]   ;;  %v2485_v57 = vld [vmem:[%s3355_s3 + $0x144] sm:$0xff]   ;;  %s2583_s29 = scalar_lea.vmem %s3312_s16, 16  ;;  %s2587_s13 = sshll.u32 %s2651_s12, 4  ;;  %s2588_s13 = int_to_ptr.vmem [resolvable:$false] %s2587_s13 }
  0x1b   : > { %v2406_v10 = vpack.c.bf16 %v388_v9, %v386_v7  ;;  %v2482_v54 = vld [vmem:[%s3355_s3 + $0xd0] sm:$0xff]   ;;  %v2486_v58 = vld [vmem:[%s3355_s3 + $0xe0] sm:$0xff]   ;;  %v2488_v60 = vld [vmem:[%s3355_s3 + $0xe8] sm:$0xff]   ;;  %p2584_p11 = scmp.ne.s32.totalorder %s3312_s16, %s2583_s29  ;;  %s2589_s22 = scalar_lea.vmem %s2588_s13, 32 }
  0x1c   : > { %2405 = vmatprep.subr.msk.bf16.mxu0 %vm2404_vm2, %v2403_v8  ;;  %630 = vmatpush1.bf16.msra.mxu1 %v2460_v14  ;;  %v2487_v59 = vld [vmem:[%s3355_s3 + $0x14c] sm:$0xff]   ;;  %v2489_v61 = vld [vmem:[%s3355_s3 + $0x154] sm:$0xff]   ;;  %v2491_v63 = vld [vmem:[%s3355_s3 + $0x15c] sm:$0xff]   ;;  %p2590_p0 = scmp.lt.s32.totalorder %s3312_s16, %s2588_s13  ;;  %p2591_p1 = scmp.lt.s32.totalorder %s2589_s22, %s2583_s29 }
  0x1d   : > { %2408 = vmatpush1.bf16.msk.msra.mxu0 %vm2404_vm2, %v2406_v10  ;;  %631 = vmatprep.subr.bf16.mxu1 %v2648_v2  ;;  %v2490_v62 = vld [vmem:[%s3355_s3 + $0xf0] sm:$0xff]   ;;  %v2492_v1 = vld [vmem:[%s3355_s3 + $0xf8] sm:$0xff]   ;;  %v2493_v3 = vld [vmem:[%s3355_s3 + $0x164] sm:$0xff]   ;;  %p2585_p12 = pnand %p2584_p11, %p2750_p5 }
  0x1e   : > { %743 = vmatprep.subr.bf16.mxu0 %v2648_v2  ;;  %v2494_v4 = vld [vmem:[%s3355_s3 + $0x100] sm:$0xff]   ;;  %v2495_v5 = vld [vmem:[%s3355_s3 + $0x16c] sm:$0xff]   ;;  %v2497_v7 = vld [vmem:[%s3355_s3 + $0x174] sm:$0xff]   ;;  %p2592_p2 = por %p2591_p1, %p2590_p0 }
  0x1f   : > { %v2496_v6 = vld [vmem:[%s3355_s3 + $0x108] sm:$0xff]   ;;  %v2498_v8 = vld [vmem:[%s3355_s3 + $0x110] sm:$0xff]   ;;  %v2499_v9 = vld [vmem:[%s3355_s3 + $0x17c] sm:$0xff]   ;;  %p2586_p13 = pneg %p2585_p12 }
  0x20   : > { %2035 = vmatmul.mubr.msk.f32.vlgmr.msra.gmra.mrb[0].mxu0 %vm396_vm3, %v385_v11  ;;  %632 = vmatpush1.bf16.msra.mxu1 %v2462_v16  ;;  %v2500_v10 = vld [vmem:[%s3355_s3 + $0x118] sm:$0xff]   ;;  %v2501_v11 = vld [vmem:[%s3355_s3 + $0x184] sm:$0xff]   ;;  %v2503_v12 = vld [vmem:[%s3355_s3 + $0x18c] ss:$0 sps:$4 sm:$0x33]  }
  0x21   : > { %744 = vmatpush1.bf16.msra.mxu0 %v2453_v13  ;;  %633 = vmatprep.subr.bf16.mxu1 %v2648_v2  ;;  %v2502_v13 = vld [vmem:[%s3355_s3 + $0x120] sm:$0xff]   ;;  %v2504_v14 = vld [vmem:[%s3355_s3 + $0x128] ss:$0 sps:$4 sm:$0x33]   ;;  %p2593_p3 = pnand %p2592_p2, %p2586_p13 }
  0x22   : > { %745 = vmatprep.subr.bf16.mxu0 %v2648_v2  ;;  %v893_v16 = vsel %vm619_vm4, %v2504_v14, 0  ;;  %v2518_v34 = vld [vmem:[%s3355_s3 + $0x1c0] sm:$0xff]   ;;  %v2520_v36 = vld [vmem:[%s3355_s3 + $0x1c8] sm:$0xff]  }
  0x23   : > { %v2552_v14 = vld [vmem:[%s3355_s3 + $0x2a8] sm:$0xff]  }
  0x24   : > { %634 = vmatpush1.bf16.msra.mxu1 %v2464_v18 }
  0x25   : > { %746 = vmatpush1.bf16.msra.mxu0 %v2455_v15  ;;  %635 = vmatprep.subr.bf16.mxu1 %v2648_v2  ;;  %v1044_v15 = vsel %vm619_vm4, %v2503_v12, 0  ;;  %v2550_v12 = vld [vmem:[%s3355_s3 + $0x2a0] sm:$0xff]  }
  0x26   : > { %747 = vmatprep.subr.bf16.mxu0 %v2648_v2 }
  0x28   : > { %636 = vmatpush1.bf16.msra.mxu1 %v2466_v21 }
  0x29   : > { %748 = vmatpush1.bf16.msra.mxu0 %v2457_v17  ;;  %637 = vmatprep.subr.bf16.mxu1 %v2648_v2  ;;  %v2505_v17 = vld [vmem:[%s3355_s3 + $0x1f4] sm:$0xff]  }
  0x2a   : > { %749 = vmatprep.subr.bf16.mxu0 %v2648_v2 }
  0x2c   : > { %638 = vmatpush1.bf16.msra.mxu1 %v2468_v22 }
  0x2d   : > { %750 = vmatpush1.bf16.msra.mxu0 %v2459_v19  ;;  %639 = vmatprep.subr.bf16.mxu1 %v2648_v2 }
  0x2e   : > { %751 = vmatprep.subr.bf16.mxu0 %v2648_v2 }
  0x30   : > { %640 = vmatpush1.bf16.msra.mxu1 %v2470_v24  ;;  %v2508_v24 = vld [vmem:[%s3355_s3 + $0x198] sm:$0xff]  }
  0x31   : > { %752 = vmatpush1.bf16.msra.mxu0 %v2461_v20  ;;  %641 = vmatprep.subr.bf16.mxu1 %v2648_v2  ;;  %v2506_v20 = vld [vmem:[%s3355_s3 + $0x190] sm:$0xff]  }
  0x32   : > { %753 = vmatprep.subr.bf16.mxu0 %v2648_v2 }
  0x34   : > { %642 = vmatpush1.bf16.msra.mxu1 %v2472_v26  ;;  %v2510_v26 = vld [vmem:[%s3355_s3 + $0x1a0] sm:$0xff]  }
  0x35   : > { %754 = vmatpush1.bf16.msra.mxu0 %v2463_v23  ;;  %643 = vmatprep.subr.bf16.mxu1 %v2648_v2  ;;  %v2507_v23 = vld [vmem:[%s3355_s3 + $0x1fc] sm:$0xff]  }
  0x36   : > { %755 = vmatprep.subr.bf16.mxu0 %v2648_v2 }
  0x38   : > { %644 = vmatpush1.bf16.msra.mxu1 %v2474_v28  ;;  %v2512_v28 = vld [vmem:[%s3355_s3 + $0x1a8] sm:$0xff]  }
  0x39   : > { %756 = vmatpush1.bf16.msra.mxu0 %v2465_v25  ;;  %645 = vmatprep.subr.bf16.mxu1 %v2648_v2  ;;  %v2509_v25 = vld [vmem:[%s3355_s3 + $0x204] sm:$0xff]  }
  0x3a   : > { %757 = vmatprep.subr.bf16.mxu0 %v2648_v2 }
  0x3c   : > { %646 = vmatpush1.bf16.msra.mxu1 %v2476_v33  ;;  %v2517_v33 = vld [vmem:[%s3355_s3 + $0x224] sm:$0xff]  }
  0x3d   : > { %758 = vmatpush1.bf16.msra.mxu0 %v2467_v27  ;;  %647 = vmatprep.subr.bf16.mxu1 %v2648_v2  ;;  %v2511_v27 = vld [vmem:[%s3355_s3 + $0x20c] sm:$0xff]  }
  0x3e   : > { %759 = vmatprep.subr.bf16.mxu0 %v2648_v2 }
  0x40   : > { %648 = vmatpush1.bf16.msra.mxu1 %v621_v37  ;;  %v2521_v37 = vld [vmem:[%s3355_s3 + $0x234] sm:$0xff]  }
  0x41   : > { %760 = vmatpush1.bf16.msra.mxu0 %v2469_v29  ;;  %895 = vmatprep.subr.bf16.mxu1 %v2648_v2  ;;  %v2513_v29 = vld [vmem:[%s3355_s3 + $0x214] sm:$0xff]  }
  0x42   : > { %761 = vmatprep.subr.bf16.mxu0 %v2648_v2 }
  0x45   : > { %762 = vmatpush1.bf16.msra.mxu0 %v2471_v30  ;;  %v2514_v30 = vld [vmem:[%s3355_s3 + $0x1b0] sm:$0xff]  }
  0x46   : > { %763 = vmatprep.subr.bf16.mxu0 %v2648_v2 }
  0x49   : > { %764 = vmatpush1.bf16.msra.mxu0 %v2473_v31  ;;  %v2515_v31 = vld [vmem:[%s3355_s3 + $0x21c] sm:$0xff]  }
  0x4a   : > { %765 = vmatprep.subr.bf16.mxu0 %v2648_v2 }
  0x4d   : > { %766 = vmatpush1.bf16.msra.mxu0 %v2475_v32  ;;  %v2516_v32 = vld [vmem:[%s3355_s3 + $0x1b8] sm:$0xff]  }
  0x4e   : > { %767 = vmatprep.subr.bf16.mxu0 %v2648_v2 }
  0x51   : > { %768 = vmatpush1.bf16.msra.mxu0 %v741_v35  ;;  %v2519_v35 = vld [vmem:[%s3355_s3 + $0x22c] sm:$0xff]  }
  0x52   : > { %1046 = vmatprep.subr.bf16.mxu0 %v2648_v2 }
  0x8e   : > { %v394_v38 = vpop.permute.xlu0 %393 }
  0xf3   : > { %v473_v39 = vpop.f32.mrb[0].mxu0 }
  0xf4   : > { %v474_v40 = vadd.f32 %v473_v39, %v394_v38  ;;  %v475_v41 = vpop.f32.mrb[1].mxu0  ;;  %v2523_v39 = vld [vmem:[%s3355_s3 + $0x23c] sm:$0xff]  }
  0xf5   : > { %v476_v42 = vadd.f32 %v475_v41, %v394_v38  ;;  %v2522_v38 = vld [vmem:[%s3355_s3 + $0x1d0] sm:$0xff]   ;;  %v2525_v41 = vld [vmem:[%s3355_s3 + $0x244] sm:$0xff]  }
  0xf6   : > { %v478_v43 = vmax.f32 %v474_v40, 0.0  ;;  %v2524_v40 = vld [vmem:[%s3355_s3 + $0x1d8] sm:$0xff]  }
  0xf7   : > { %v479_v44 = vmax.f32 %v476_v42, 0.0  ;;  %v2526_v42 = vld [vmem:[%s3355_s3 + $0x1e0] sm:$0xff]  }
  0xf8   : > { %v2881_v45 = vpack.c.bf16 %v478_v43, %v478_v43  ;;  %v2527_v43 = vld [vmem:[%s3355_s3 + $0x24c] sm:$0xff]  }
  0xf9   : > { %v2883_v46 = vpack.c.bf16 %v479_v44, %v479_v44  ;;  %v2529_v44 = vld [vmem:[%s3355_s3 + $0x254] ss:$0 sps:$4 sm:$0x33]  }
  0xfa   : > { %v2898_v50 = vshrl.u32 %v2881_v45, 16  ;;  %v811_v21 = vrot.slane %v2881_v45, 1 }
  0xfb   : > { %2088 = vmatprep.mubr.msk.bf16.mxu0 %vm615_vm5, %v2883_v46  ;;  %v2891_v48 = vshrl.u32 %v2883_v46, 16  ;;  %v812_v51 = vrot.slane %v2883_v46, 1  ;;  %v1114_v22 = vrot.slane %v2883_v46, 2 }
  0xfc   : > { %776 = vmatmul.mubr.bf16.vlgmr.msra.gmra.mrb[4].mxu0 %v2881_v45  ;;  %v962_v18 = vrot.slane %v2898_v50, 1 }
  0xfd   : > { %1047 = vmatpush1.bf16.msra.mxu0 %v2479_v47  ;;  %2074 = vmatprep.mubr.msk.bf16.mxu1 %vm615_vm5, %v2891_v48  ;;  %v963_v52 = vrot.slane %v2891_v48, 1  ;;  %v1265_v19 = vrot.slane %v2891_v48, 2  ;;  %v2528_v47 = vld [vmem:[%s3355_s3 + $0x1e8] sm:$0xff]  }
  0xfe   : > { %656 = vmatmul.mubr.bf16.vlgmr.msra.gmra.mrb[0].mxu1 %v2898_v50  ;;  %1048 = vmatprep.subr.bf16.mxu0 %v2648_v2 }
  0xff   : > { %896 = vmatpush1.bf16.msra.mxu1 %v2480_v49  ;;  %2127 = vmatprep.mubr.msk.bf16.mxu1 %vm615_vm5, %v812_v51  ;;  %v2530_v49 = vld [vmem:[%s3355_s3 + $0x1f0] ss:$0 sps:$4 sm:$0x33]   ;;  %v1346_v51 = vsel %vm619_vm4, %v2529_v44, 0 }
 0x100   : > { %2166 = vmatprep.mubr.msk.bf16.mxu0 %vm615_vm5, %v963_v52  ;;  %897 = vmatprep.subr.bf16.mxu1 %v2648_v2  ;;  %v1195_v52 = vsel %vm619_vm4, %v2530_v49, 0  ;;  %v2564_v49 = vld [vmem:[%s3357_s5 + $0x38] sm:$0xff]  }
 0x101   : > { %1049 = vmatpush1.bf16.msra.mxu0 %v2481_v53  ;;  %v2531_v53 = vld [vmem:[%s3355_s3 + $0x2bc] sm:$0xff]  }
 0x102   : > { %1050 = vmatprep.subr.bf16.mxu0 %v2648_v2 }
 0x103   : > { %898 = vmatpush1.bf16.msra.mxu1 %v2482_v54  ;;  %v1264_v54 = vrot.slane %v2898_v50, 2 }
 0x104   : > { %899 = vmatprep.subr.bf16.mxu1 %v2648_v2 }
 0x105   : > { %1051 = vmatpush1.bf16.msra.mxu0 %v2483_v55  ;;  %v1567_v55 = vrot.slane %v2891_v48, 3  ;;  %v2534_v48 = vld [vmem:[%s3355_s3 + $0x260] sm:$0xff]  }
 0x106   : > { %1052 = vmatprep.subr.bf16.mxu0 %v2648_v2 }
 0x107   : > { %900 = vmatpush1.bf16.msra.mxu1 %v2484_v56  ;;  %v2532_v56 = vld [vmem:[%s3355_s3 + $0x258] sm:$0xff]  }
 0x108   : > { %901 = vmatprep.subr.bf16.mxu1 %v2648_v2 }
 0x109   : > { %1053 = vmatpush1.bf16.msra.mxu0 %v2485_v57  ;;  %v1113_v57 = vrot.slane %v2881_v45, 2 }
 0x10a   : > { %1054 = vmatprep.subr.bf16.mxu0 %v2648_v2 }
 0x10b   : > { %902 = vmatpush1.bf16.msra.mxu1 %v2486_v58  ;;  %v1416_v58 = vrot.slane %v2883_v46, 3  ;;  %v2535_v46 = vld [vmem:[%s3355_s3 + $0x2cc] sm:$0xff]  }
 0x10c   : > { %903 = vmatprep.subr.bf16.mxu1 %v2648_v2 }
 0x10d   : > { %1055 = vmatpush1.bf16.msra.mxu0 %v2487_v59  ;;  %v2533_v59 = vld [vmem:[%s3355_s3 + $0x2c4] sm:$0xff]  }
 0x10e   : > { %1056 = vmatprep.subr.bf16.mxu0 %v2648_v2 }
 0x10f   : > { %904 = vmatpush1.bf16.msra.mxu1 %v2488_v60  ;;  %v2536_v60 = vld [vmem:[%s3355_s3 + $0x268] sm:$0xff]  }
 0x110   : > { %905 = vmatprep.subr.bf16.mxu1 %v2648_v2 }
 0x111   : > { %1057 = vmatpush1.bf16.msra.mxu0 %v2489_v61  ;;  %v2537_v61 = vld [vmem:[%s3355_s3 + $0x2d4] sm:$0xff]  }
 0x112   : > { %1058 = vmatprep.subr.bf16.mxu0 %v2648_v2 }
 0x113   : > { %906 = vmatpush1.bf16.msra.mxu1 %v2490_v62  ;;  %v2538_v62 = vld [vmem:[%s3355_s3 + $0x270] sm:$0xff]  }
 0x114   : > { %907 = vmatprep.subr.bf16.mxu1 %v2648_v2 }
 0x115   : > { %1059 = vmatpush1.bf16.msra.mxu0 %v2491_v63  ;;  %v2539_v63 = vld [vmem:[%s3355_s3 + $0x2dc] sm:$0xff]  }
 0x116   : > { %1060 = vmatprep.subr.bf16.mxu0 %v2648_v2 }
 0x117   : > { %908 = vmatpush1.bf16.msra.mxu1 %v2492_v1  ;;  %v2540_v1 = vld [vmem:[%s3355_s3 + $0x278] sm:$0xff]  }
 0x118   : > { %909 = vmatprep.subr.bf16.mxu1 %v2648_v2 }
 0x119   : > { %1061 = vmatpush1.bf16.msra.mxu0 %v2493_v3  ;;  %v2541_v3 = vld [vmem:[%s3355_s3 + $0x2e4] sm:$0xff]  }
 0x11a   : > { %1062 = vmatprep.subr.bf16.mxu0 %v2648_v2 }
 0x11b   : > { %910 = vmatpush1.bf16.msra.mxu1 %v2494_v4  ;;  %v2542_v4 = vld [vmem:[%s3355_s3 + $0x280] sm:$0xff]  }
 0x11c   : > { %911 = vmatprep.subr.bf16.mxu1 %v2648_v2 }
 0x11d   : > { %1063 = vmatpush1.bf16.msra.mxu0 %v2495_v5  ;;  %v2543_v5 = vld [vmem:[%s3355_s3 + $0x2ec] sm:$0xff]  }
 0x11e   : > { %1064 = vmatprep.subr.bf16.mxu0 %v2648_v2 }
 0x11f   : > { %912 = vmatpush1.bf16.msra.mxu1 %v2496_v6  ;;  %v2544_v6 = vld [vmem:[%s3355_s3 + $0x288] sm:$0xff]  }
 0x120   : > { %913 = vmatprep.subr.bf16.mxu1 %v2648_v2 }
 0x121   : > { %1065 = vmatpush1.bf16.msra.mxu0 %v2497_v7  ;;  %v2545_v7 = vld [vmem:[%s3355_s3 + $0x2f4] sm:$0xff]  }
 0x122   : > { %1066 = vmatprep.subr.bf16.mxu0 %v2648_v2 }
 0x123   : > { %914 = vmatpush1.bf16.msra.mxu1 %v2498_v8  ;;  %v2546_v8 = vld [vmem:[%s3355_s3 + $0x290] sm:$0xff]  }
 0x124   : > { %915 = vmatprep.subr.bf16.mxu1 %v2648_v2 }
 0x125   : > { %1067 = vmatpush1.bf16.msra.mxu0 %v2499_v9  ;;  %v2547_v9 = vld [vmem:[%s3355_s3 + $0x2fc] sm:$0xff]  }
 0x126   : > { %1068 = vmatprep.subr.bf16.mxu0 %v2648_v2 }
 0x127   : > { %916 = vmatpush1.bf16.msra.mxu1 %v2500_v10  ;;  %v2548_v10 = vld [vmem:[%s3355_s3 + $0x298] sm:$0xff]  }
 0x128   : > { %917 = vmatprep.subr.bf16.mxu1 %v2648_v2 }
 0x129   : > { %1069 = vmatpush1.bf16.msra.mxu0 %v2501_v11  ;;  %v2549_v11 = vld [vmem:[%s3355_s3 + $0x304] sm:$0xff]  }
 0x12a   : > { %1070 = vmatprep.subr.bf16.mxu0 %v2648_v2 }
 0x12b   : > { %918 = vmatpush1.bf16.msra.mxu1 %v2502_v13  ;;  %v2551_v13 = vld [vmem:[%s3355_s3 + $0x30c] sm:$0xff]  }
 0x12c   : > { %919 = vmatprep.subr.bf16.mxu1 %v2648_v2 }
 0x12d   : > { %1071 = vmatpush1.bf16.msra.mxu0 %v1044_v15  ;;  %v2553_v15 = vld [vmem:[%s3355_s3 + $0x314] sm:$0xff]  }
 0x12e   : > { %1348 = vmatprep.subr.bf16.mxu0 %v2648_v2 }
 0x12f   : > { %920 = vmatpush1.bf16.msra.mxu1 %v893_v16  ;;  %v2555_v16 = vld [vmem:[%s3355_s3 + $0x31c] ss:$0 sps:$4 sm:$0x33]  }
 0x130   : > { %1079 = vmatmul.mubr.bf16.vlgmr.msra.gmra.mrb[8].mxu0 %v962_v18  ;;  %1197 = vmatprep.subr.bf16.mxu1 %v2648_v2  ;;  %v2556_v18 = vld [vmem:[%s3355_s3 + $0x2b8] ss:$0 sps:$4 sm:$0x33]  }
 0x131   : > { %1349 = vmatpush1.bf16.msra.mxu0 %v2505_v17  ;;  %2244 = vmatprep.mubr.msk.bf16.mxu0 %vm615_vm5, %v1265_v19  ;;  %v2554_v17 = vld [vmem:[%s3355_s3 + $0x2b0] sm:$0xff]   ;;  %v1648_v19 = vsel %vm619_vm4, %v2555_v16, 0 }
 0x132   : > { %928 = vmatmul.mubr.bf16.vlgmr.msra.gmra.mrb[4].mxu1 %v811_v21  ;;  %1350 = vmatprep.subr.bf16.mxu0 %v2648_v2  ;;  %v1566_v21 = vrot.slane %v2898_v50, 3  ;;  %v2557_v50 = vld [vmem:[%s3357_s5] sm:$0xff]   ;;  %v2567_v16 = vld [vmem:[%s3359_s7 + $0x10] sm:$0xff]  }
 0x133   : > { %1198 = vmatpush1.bf16.msra.mxu1 %v2506_v20  ;;  %2205 = vmatprep.mubr.msk.bf16.mxu1 %vm615_vm5, %v1114_v22  ;;  %v1497_v20 = vsel %vm619_vm4, %v2556_v18, 0  ;;  %v1415_v22 = vrot.slane %v2881_v45, 3  ;;  %v2558_v45 = vld [vmem:[%s3357_s5 + $0x8] sm:$0xff]   ;;  %v1716_v18 = vld [vmem:[%s3358_s6] sm:$0x1] }
 0x134   : > { %1199 = vmatprep.subr.bf16.mxu1 %v2648_v2 }
 0x135   : > { %1351 = vmatpush1.bf16.msra.mxu0 %v2507_v23 }
 0x136   : > { %1352 = vmatprep.subr.bf16.mxu0 %v2648_v2 }
 0x137   : > { %1200 = vmatpush1.bf16.msra.mxu1 %v2508_v24 }
 0x138   : > { %1201 = vmatprep.subr.bf16.mxu1 %v2648_v2 }
 0x139   : > { %1353 = vmatpush1.bf16.msra.mxu0 %v2509_v25 }
 0x13a   : > { %1354 = vmatprep.subr.bf16.mxu0 %v2648_v2 }
 0x13b   : > { %1202 = vmatpush1.bf16.msra.mxu1 %v2510_v26 }
 0x13c   : > { %1203 = vmatprep.subr.bf16.mxu1 %v2648_v2 }
 0x13d   : > { %1355 = vmatpush1.bf16.msra.mxu0 %v2511_v27 }
 0x13e   : > { %1356 = vmatprep.subr.bf16.mxu0 %v2648_v2 }
 0x13f   : > { %1204 = vmatpush1.bf16.msra.mxu1 %v2512_v28 }
 0x140   : > { %1205 = vmatprep.subr.bf16.mxu1 %v2648_v2 }
 0x141   : > { %1357 = vmatpush1.bf16.msra.mxu0 %v2513_v29 }
 0x142   : > { %1358 = vmatprep.subr.bf16.mxu0 %v2648_v2 }
 0x143   : > { %1206 = vmatpush1.bf16.msra.mxu1 %v2514_v30 }
 0x144   : > { %1207 = vmatprep.subr.bf16.mxu1 %v2648_v2 }
 0x145   : > { %1359 = vmatpush1.bf16.msra.mxu0 %v2515_v31  ;;  %v2559_v31 = vld [vmem:[%s3357_s5 + $0x10] sm:$0xff]  }
 0x146   : > { %1360 = vmatprep.subr.bf16.mxu0 %v2648_v2 }
 0x147   : > { %1208 = vmatpush1.bf16.msra.mxu1 %v2516_v32  ;;  %v2560_v32 = vld [vmem:[%s3357_s5 + $0x18] sm:$0xff]  }
 0x148   : > { %1209 = vmatprep.subr.bf16.mxu1 %v2648_v2 }
 0x149   : > { %1361 = vmatpush1.bf16.msra.mxu0 %v2517_v33  ;;  %v2561_v33 = vld [vmem:[%s3357_s5 + $0x20] sm:$0xff]  }
 0x14a   : > { %1362 = vmatprep.subr.bf16.mxu0 %v2648_v2 }
 0x14b   : > { %1210 = vmatpush1.bf16.msra.mxu1 %v2518_v34 }
 0x14c   : > { %1211 = vmatprep.subr.bf16.mxu1 %v2648_v2 }
 0x14d   : > { %1363 = vmatpush1.bf16.msra.mxu0 %v2519_v35  ;;  %v2562_v35 = vld [vmem:[%s3357_s5 + $0x28] sm:$0xff]  }
 0x14e   : > { %1364 = vmatprep.subr.bf16.mxu0 %v2648_v2 }
 0x14f   : > { %1212 = vmatpush1.bf16.msra.mxu1 %v2520_v36 }
 0x150   : > { %1213 = vmatprep.subr.bf16.mxu1 %v2648_v2 }
 0x151   : > { %1365 = vmatpush1.bf16.msra.mxu0 %v2521_v37 }
 0x152   : > { %1366 = vmatprep.subr.bf16.mxu0 %v2648_v2 }
 0x153   : > { %1214 = vmatpush1.bf16.msra.mxu1 %v2522_v38 }
 0x154   : > { %1215 = vmatprep.subr.bf16.mxu1 %v2648_v2 }
 0x155   : > { %1367 = vmatpush1.bf16.msra.mxu0 %v2523_v39  ;;  %v2563_v39 = vld [vmem:[%s3357_s5 + $0x30] sm:$0xff]  }
 0x156   : > { %1368 = vmatprep.subr.bf16.mxu0 %v2648_v2 }
 0x157   : > { %1216 = vmatpush1.bf16.msra.mxu1 %v2524_v40 }
 0x158   : > { %1217 = vmatprep.subr.bf16.mxu1 %v2648_v2 }
 0x159   : > { %1369 = vmatpush1.bf16.msra.mxu0 %v2525_v41 }
 0x15a   : > { %1370 = vmatprep.subr.bf16.mxu0 %v2648_v2 }
 0x15b   : > { %1218 = vmatpush1.bf16.msra.mxu1 %v2526_v42 }
 0x15c   : > { %1219 = vmatprep.subr.bf16.mxu1 %v2648_v2 }
 0x15d   : > { %1371 = vmatpush1.bf16.msra.mxu0 %v2527_v43 }
 0x15e   : > { %1372 = vmatprep.subr.bf16.mxu0 %v2648_v2 }
 0x15f   : > { %1220 = vmatpush1.bf16.msra.mxu1 %v2528_v47 }
 0x160   : > { %1221 = vmatprep.subr.bf16.mxu1 %v2648_v2 }
 0x161   : > { %1373 = vmatpush1.bf16.msra.mxu0 %v1346_v51 }
 0x162   : > { %1650 = vmatprep.subr.bf16.mxu0 %v2648_v2 }
 0x163   : > { %1222 = vmatpush1.bf16.msra.mxu1 %v1195_v52 }
 0x164   : > { %1381 = vmatmul.mubr.bf16.vlgmr.msra.gmra.mrb[12].mxu0 %v1264_v54  ;;  %1499 = vmatprep.subr.bf16.mxu1 %v2648_v2 }
 0x165   : > { %1651 = vmatpush1.bf16.msra.mxu0 %v2531_v53  ;;  %2322 = vmatprep.mubr.msk.bf16.mxu0 %vm615_vm5, %v1567_v55 }
 0x166   : > { %1230 = vmatmul.mubr.bf16.vlgmr.msra.gmra.mrb[8].mxu1 %v1113_v57  ;;  %1652 = vmatprep.subr.bf16.mxu0 %v2648_v2 }
 0x167   : > { %1500 = vmatpush1.bf16.msra.mxu1 %v2532_v56  ;;  %2283 = vmatprep.mubr.msk.bf16.mxu1 %vm615_vm5, %v1416_v58 }
 0x168   : > { %1501 = vmatprep.subr.bf16.mxu1 %v2648_v2 }
 0x169   : > { %1653 = vmatpush1.bf16.msra.mxu0 %v2533_v59 }
 0x16a   : > { %1654 = vmatprep.subr.bf16.mxu0 %v2648_v2 }
 0x16b   : > { %1502 = vmatpush1.bf16.msra.mxu1 %v2534_v48 }
 0x16c   : > { %1503 = vmatprep.subr.bf16.mxu1 %v2648_v2 }
 0x16d   : > { %1655 = vmatpush1.bf16.msra.mxu0 %v2535_v46 }
 0x16e   : > { %1656 = vmatprep.subr.bf16.mxu0 %v2648_v2 }
 0x16f   : > { %1504 = vmatpush1.bf16.msra.mxu1 %v2536_v60 }
 0x170   : > { %1505 = vmatprep.subr.bf16.mxu1 %v2648_v2 }
 0x171   : > { %1657 = vmatpush1.bf16.msra.mxu0 %v2537_v61 }
 0x172   : > { %1658 = vmatprep.subr.bf16.mxu0 %v2648_v2 }
 0x173   : > { %1506 = vmatpush1.bf16.msra.mxu1 %v2538_v62 }
 0x174   : > { %1507 = vmatprep.subr.bf16.mxu1 %v2648_v2 }
 0x175   : > { %1659 = vmatpush1.bf16.msra.mxu0 %v2539_v63 }
 0x176   : > { %1660 = vmatprep.subr.bf16.mxu0 %v2648_v2 }
 0x177   : > { %1508 = vmatpush1.bf16.msra.mxu1 %v2540_v1 }
 0x178   : > { %1509 = vmatprep.subr.bf16.mxu1 %v2648_v2 }
 0x179   : > { %1661 = vmatpush1.bf16.msra.mxu0 %v2541_v3 }
 0x17a   : > { %1662 = vmatprep.subr.bf16.mxu0 %v2648_v2 }
 0x17b   : > { %1510 = vmatpush1.bf16.msra.mxu1 %v2542_v4  ;;  %v1691_v4 = vld [vmem:[%s3356_s4] sm:$0x1] }
 0x17c   : > { %1511 = vmatprep.subr.bf16.mxu1 %v2648_v2 }
 0x17d   : > { %1663 = vmatpush1.bf16.msra.mxu0 %v2543_v5 }
 0x17e   : > { %1664 = vmatprep.subr.bf16.mxu0 %v2648_v2 }
 0x17f   : > { %1512 = vmatpush1.bf16.msra.mxu1 %v2544_v6 }
 0x180   : > { %1513 = vmatprep.subr.bf16.mxu1 %v2648_v2 }
 0x181   : > { %1665 = vmatpush1.bf16.msra.mxu0 %v2545_v7 }
 0x182   : > { %1666 = vmatprep.subr.bf16.mxu0 %v2648_v2 }
 0x183   : > { %1514 = vmatpush1.bf16.msra.mxu1 %v2546_v8 }
 0x184   : > { %1515 = vmatprep.subr.bf16.mxu1 %v2648_v2 }
 0x185   : > { %1667 = vmatpush1.bf16.msra.mxu0 %v2547_v9 }
 0x186   : > { %1668 = vmatprep.subr.bf16.mxu0 %v2648_v2 }
 0x187   : > { %1516 = vmatpush1.bf16.msra.mxu1 %v2548_v10 }
 0x188   : > { %1517 = vmatprep.subr.bf16.mxu1 %v2648_v2 }
 0x189   : > { %1669 = vmatpush1.bf16.msra.mxu0 %v2549_v11 }
 0x18a   : > { %1670 = vmatprep.subr.bf16.mxu0 %v2648_v2 }
 0x18b   : > { %1518 = vmatpush1.bf16.msra.mxu1 %v2550_v12 }
 0x18c   : > { %1519 = vmatprep.subr.bf16.mxu1 %v2648_v2 }
 0x18d   : > { %1671 = vmatpush1.bf16.msra.mxu0 %v2551_v13 }
 0x18e   : > { %1672 = vmatprep.subr.bf16.mxu0 %v2648_v2 }
 0x18f   : > { %1520 = vmatpush1.bf16.msra.mxu1 %v2552_v14  ;;  %v2565_v14 = vld [vmem:[%s3359_s7] sm:$0xff]  }
 0x190   : > { %1521 = vmatprep.subr.bf16.mxu1 %v2648_v2 }
 0x191   : > { %1673 = vmatpush1.bf16.msra.mxu0 %v2553_v15  ;;  %v2566_v15 = vld [vmem:[%s3359_s7 + $0x8] sm:$0xff]  }
 0x192   : > { %1674 = vmatprep.subr.bf16.mxu0 %v2648_v2 }
 0x193   : > { %1522 = vmatpush1.bf16.msra.mxu1 %v2554_v17  ;;  %v2568_v17 = vld [vmem:[%s3359_s7 + $0x18] sm:$0xff]  }
 0x194   : > { %1523 = vmatprep.subr.bf16.mxu1 %v2648_v2 }
 0x195   : > { %1675 = vmatpush1.bf16.msra.mxu0 %v1648_v19 }
 0x196   : > { %2383 = vmatprep.subr.bf16.mxu0 %v2647_v0 }
 0x197   : > { %1524 = vmatpush1.bf16.msra.mxu1 %v1497_v20 }
 0x198   : > { %1683 = vmatmul.mubr.bf16.vlgmr.msra.gmra.mrb[16].mxu0 %v1566_v21  ;;  %2363 = vmatprep.subr.bf16.mxu1 %v2647_v0 }
 0x199   : > { %2391 = vmatprep.mubr.msk.bf16.mxu0 %vm2650_vm6, %v2647_v0  ;;  %2384 = vmatpush3.bf16.msra.mxu0 %v2565_v14 }
 0x19a   : > { %1532 = vmatmul.mubr.bf16.vlgmr.msra.gmra.mrb[12].mxu1 %v1415_v22  ;;  %2385 = vmatprep.subr.bf16.mxu0 %v2647_v0 }
 0x19b   : > { %2364 = vmatpush3.bf16.msra.mxu1 %v2557_v50  ;;  %2379 = vmatprep.mubr.msk.bf16.mxu1 %vm2650_vm6, %v2647_v0 }
 0x19c   : > { %2365 = vmatprep.subr.bf16.mxu1 %v2647_v0 }
 0x19d   : > { %2386 = vmatpush3.bf16.msra.mxu0 %v2566_v15 }
 0x19e   : > { %2387 = vmatprep.subr.bf16.mxu0 %v2647_v0 }
 0x19f   : > { %2366 = vmatpush3.bf16.msra.mxu1 %v2558_v45 }
 0x1a0   : > { %2367 = vmatprep.subr.bf16.mxu1 %v2647_v0 }
 0x1a1   : > { %2388 = vmatpush3.bf16.msra.mxu0 %v2567_v16 }
 0x1a2   : > { %2389 = vmatprep.subr.bf16.mxu0 %v2647_v0 }
 0x1a3   : > { %2368 = vmatpush3.bf16.msra.mxu1 %v2559_v31 }
 0x1a4   : > { %2369 = vmatprep.subr.bf16.mxu1 %v2647_v0 }
 0x1a5   : > { %2390 = vmatpush3.bf16.msra.mxu0 %v2568_v17 }
 0x1a6   : > { %2395 = vmatprep.subr.bf16.mxu0 %v2647_v0 }
 0x1a7   : > { %2370 = vmatpush3.bf16.msra.mxu1 %v2560_v32 }
 0x1a8   : > { %2371 = vmatprep.subr.bf16.mxu1 %v2647_v0 }
 0x1ab   : > { %2372 = vmatpush3.bf16.msra.mxu1 %v2561_v33 }
 0x1ac   : > { %2373 = vmatprep.subr.bf16.mxu1 %v2647_v0 }
 0x1af   : > { %2374 = vmatpush3.bf16.msra.mxu1 %v2562_v35 }
 0x1b0   : > { %2375 = vmatprep.subr.bf16.mxu1 %v2647_v0 }
 0x1b3   : > { %2376 = vmatpush3.bf16.msra.mxu1 %v2563_v39 }
 0x1b4   : > { %2377 = vmatprep.subr.bf16.mxu1 %v2647_v0 }
 0x1b7   : > { %2378 = vmatpush3.bf16.msra.mxu1 %v2564_v49 }
 0x1cf   : > { %v777_v23 = vpop.f32.mrb[4].mxu0 }
 0x1d0   : > { %v779_v24 = vpop.f32.mrb[5].mxu0 }
 0x1d1   : > { %v657_v25 = vpop.f32.mrb[0].mxu1  ;;  %v780_v26 = vpop.f32.mrb[6].mxu0 }
 0x1d2   : > { %v778_v27 = vadd.f32 %v777_v23, %v657_v25  ;;  %v659_v2 = vpop.f32.mrb[1].mxu1  ;;  %v781_v28 = vpop.f32.mrb[7].mxu0 }
 0x1d3   : > { %v660_v29 = vpop.f32.mrb[2].mxu1  ;;  %v2569_v28 = vld [vmem:[%s3361_s9] sm:$0xff]  }
 0x1d4   : > { %v661_v30 = vpop.f32.mrb[3].mxu1  ;;  %v2570_v29 = vld [vmem:[%s3361_s9 + $0x8] sm:$0xff]  }
 0x1d5   : > { %v1820_v30 = vld [vmem:[%s3360_s8] sm:$0x1] }
 0x203   : > { %v1080_v34 = vpop.f32.mrb[8].mxu0 }
 0x204   : > { %v1082_v36 = vpop.f32.mrb[9].mxu0 }
 0x205   : > { %v929_v37 = vpop.f32.mrb[4].mxu1  ;;  %v1083_v38 = vpop.f32.mrb[10].mxu0 }
 0x206   : > { %v935_v40 = vadd.f32 %v929_v37, %v778_v27  ;;  %v931_v41 = vpop.f32.mrb[5].mxu1  ;;  %v1084_v42 = vpop.f32.mrb[11].mxu0  ;;  %v1900_v38 = vld [vmem:[%s3362_s10] sm:$0x1] }
 0x207   : > { %v932_v43 = vpop.f32.mrb[6].mxu1 }
 0x208   : > { %v933_v44 = vpop.f32.mrb[7].mxu1  ;;  %v1086_v47 = vadd.f32 %v1080_v34, %v935_v40 }
 0x237   : > { %v1382_v51 = vpop.f32.mrb[12].mxu0 }
 0x238   : > { %v1384_v52 = vpop.f32.mrb[13].mxu0 }
 0x239   : > { %v1231_v53 = vpop.f32.mrb[8].mxu1  ;;  %v1385_v54 = vpop.f32.mrb[14].mxu0 }
 0x23a   : > { %v1237_v55 = vadd.f32 %v1231_v53, %v1086_v47  ;;  %v1233_v56 = vpop.f32.mrb[9].mxu1  ;;  %v1386_v57 = vpop.f32.mrb[15].mxu0 }
 0x23b   : > { %v1234_v58 = vpop.f32.mrb[10].mxu1 }
 0x23c   : > { %v1235_v59 = vpop.f32.mrb[11].mxu1  ;;  %v1388_v48 = vadd.f32 %v1382_v51, %v1237_v55 }
 0x26b   : > { %v1684_v46 = vpop.f32.mrb[16].mxu0 }
 0x26c   : > { %v1686_v60 = vpop.f32.mrb[17].mxu0 }
 0x26d   : > { %v1533_v61 = vpop.f32.mrb[12].mxu1  ;;  %v1687_v62 = vpop.f32.mrb[18].mxu0 }
 0x26e   : > { %v1539_v63 = vadd.f32 %v1533_v61, %v1388_v48  ;;  %v1535_v1 = vpop.f32.mrb[13].mxu1  ;;  %v1688_v3 = vpop.f32.mrb[19].mxu0 }
 0x26f   : > { %v1536_v5 = vpop.f32.mrb[14].mxu1 }
 0x270   : > { %v1690_v6 = vadd.f32 %v1684_v46, %v1539_v63  ;;  %v1537_v7 = vpop.f32.mrb[15].mxu1 }
 0x272   : > { %v1692_v8 = vadd.f32 %v1691_v4, %v1690_v6 }
 0x274   : > { %v2323_v9 = vmul.f32 -1.442695, %v1692_v8 }
 0x276   : > { %2571 = vpow2.f32 %v2323_v9 }
 0x280   : > { %v2572_v10 = vpop.eup %2571 }
 0x281   : > { %v1696_v11 = vadd.f32 1.0, %v2572_v10 }
 0x283   : > { %2573 = vrcp.f32 %v1696_v11 }
 0x28d   : > { %v2574_v12 = vpop.eup %2573 }
 0x28e   : > { %v1699_v13 = vpack.c.bf16 %v2574_v12, %v2574_v12 }
 0x290   : > { %2380 = vmatmul.mubr.bf16.vlgmr.msra.gmra.mrb[16].mxu1 %v1699_v13 }
 0x363   : > { %v1799_v19 = vpop.f32.mrb[16].mxu1 }
 0x364   : > { %v1800_v20 = vadd.f32 %v1799_v19, %v1716_v18  ;;  %v2381_v21 = vpop.f32.mrb[17].mxu1 }
 0x365   : > { %v1802_v22 = vpop.f32.mrb[18].mxu1 }
 0x366   : > { %v2332_v23 = vmul.f32 -1.442695, %v1800_v20  ;;  %v2382_v24 = vpop.f32.mrb[19].mxu1 }
 0x368   : > { %2575 = vpow2.f32 %v2332_v23 }
 0x372   : > { %v2576_v25 = vpop.eup %2575 }
 0x373   : > { %v1808_v26 = vadd.f32 1.0, %v2576_v25 }
 0x375   : > { %2577 = vrcp.f32 %v1808_v26 }
 0x37f   : > { %v2578_v27 = vpop.eup %2577 }
 0x380   : > { %v1811_v2 = vpack.c.bf16 %v2578_v27, %v2578_v27 }
 0x382   : > { %2392 = vmatmul.mubr.msk.bf16.vlgmr.msra.gmra.mrb[20].mxu0 %vm1845_vm7, %v1811_v2 }
 0x383   : > { %2399 = vmatprep.mubr.msk.bf16.mxu0 %vm2650_vm6, %v2647_v0  ;;  %2396 = vmatpush3.bf16.msra.mxu0 %v2569_v28 }
 0x384   : > { %2397 = vmatprep.subr.bf16.mxu0 %v2647_v0 }
 0x387   : > { %2398 = vmatpush3.bf16.msra.mxu0 %v2570_v29 }
 0x455   : > { %v1883_v50 = vpop.f32.mrb[20].mxu0 }
 0x456   : > { %v1884_v45 = vadd.f32 %v1883_v50, %v1820_v30  ;;  %v2393_v31 = vpop.f32.mrb[21].mxu0 }
 0x457   : > { %v1886_v32 = vpop.f32.mrb[22].mxu0 }
 0x458   : > { %v2338_v33 = vmul.f32 -1.442695, %v1884_v45  ;;  %v2394_v34 = vpop.f32.mrb[23].mxu0 }
 0x45a   : > { %2579 = vpow2.f32 %v2338_v33 }
 0x464   : > { %v2580_v35 = vpop.eup %2579 }
 0x465   : > { %v1892_v0 = vadd.f32 1.0, %v2580_v35 }
 0x467   : > { %2581 = vrcp.f32 %v1892_v0 }
 0x471   : > { %v2582_v36 = vpop.eup %2581 }
 0x472   : > { %v1895_v37 = vpack.c.bf16 %v2582_v36, %v2582_v36 }
 0x474   : > { %2400 = vmatmul.mubr.msk.bf16.vlgmr.msra.gmra.mrb[24].mxu0 %vm1913_vm8, %v1895_v37 }
 0x547   : > { %v1951_v39 = vpop.f32.mrb[24].mxu0 }
 0x548   : > { %v1952_v40 = vadd.f32 %v1951_v39, %v1900_v38  ;;  %v2401_v41 = vpop.f32.mrb[25].mxu0 }
 0x549   : > { %v1954_v42 = vpop.f32.mrb[26].mxu0 }
 0x54a   : > { %v2402_v43 = vpop.f32.mrb[27].mxu0  ;;  %1958 = vst.msk [vmem:[%s378_s15] sm:$0x1] %vm1957_vm9, %v1952_v40 }
 0x54b   : > { %2596 = shalt.err (!%p2593_p3)
}
 0x54c   : > { %s2597_s30 = scalar_lea.hbm %s3310_s25, 16  ;;  %s2601_s24 = scalar_lea.hbm %s3363_s11, 32 }
 0x54d   : > { %p2598_p4 = scmp.ne.s32.totalorder %s3310_s25, %s2597_s30  ;;  %p2602_p9 = scmp.lt.u32.totalorder %s3310_s25, %s3363_s11 }
 0x54e   : > { %p2603_p10 = scmp.lt.u32.totalorder %s2601_s24, %s2597_s30  ;;  %p2605_p12 = scmp.lt.u32.totalorder %s2597_s30, %s3310_s25 }
 0x54f   : > { %p2599_p7 = pnand %p2598_p4, %p2750_p5 }
 0x550   : > { %p2604_p11 = por %p2603_p10, %p2602_p9 }
 0x551   : > { %p2600_p8 = pneg %p2599_p7 }
 0x552   : > { %p2606_p13 = por %p2605_p12, %p2604_p11 }
 0x554   : > { %p2607_p0 = pnand %p2606_p13, %p2600_p8 }
 0x556   : > { %2610 = shalt.err (!%p2607_p0)
}
 0x557   : > { %2409 = dma.vmem_to_hbm [thread:$0]  (%p2750_p5), %s3312_s16, 16, %s3310_s25, %s1960_s21  }
 0x558 PF: > { %p2415_p1 = scmp.ge.s32.totalorder %s2645_s20, 2  ;;  %s1984_s29 = sand.u32 1, %s2633_s17  }
 0x559   : > { %s1985_s22 = scalar_lea.sflag [#allocation3], %s1984_s29 }
 0x55a   : > { %p2412_p2 = pnand %p2415_p1, %p2754_p6 }
 0x55c   : > { %2628 = dma.done.wait (!%p2412_p2), %s1985_s22, 16  }
 0x55d   : > { %2630 = vsyncadd (!%p2412_p2), %s1985_s22, 4294967280  ;;  %p21_p3 = scmp.ge.s32.totalorder %s2737_s23, 4   ;;  %s3366_s17 = smov %s2637_s18 }
 0x55e   : > { %s3367_s18 = smov %s2641_s19  ;;  %s3368_s19 = smov %s2748_s26 }
 0x55f   : > { %s3369_s20 = smov %s2737_s23  ;;  %23 = sbr.rel (!%p21_p3) target bundleno = 3 (0x3), region = 106 }
 0x566   :  { %1989 = vsyncpa [#allocation3], 1 }
 0x567   :  { %1991 = vsyncpa [#allocation3 + $0x1], 1 }

</bundles_post_ra>
